<compile_context>
chip_gen: v5e
topology: v5e:2x2
jax: 0.10.0
libtpu: 0.0.40
codegen_flags: <defaults>
</compile_context>

<pallas_src>
import functools

import jax
import jax.numpy as jnp
from jax.experimental import pallas as pl
from jax.experimental.pallas import tpu as pltpu


_TILE_F32_ELEMS = 512 * 1024     # ~2 MiB f32 working set per x tile (pipeline double-buffers it)


def _round_up(a, m):
    return (a + m - 1) // m * m


def _choose_tile(rows, row_elems, tile_rows=None):
    """Pick (tile_rows, num_tiles) over the folded (R, k*D) row axis."""
    if tile_rows is not None:
        tr = _round_up(max(1, int(tile_rows)), 128)         # lane-dense blocks -> multiple of 128
    else:
        tr = max(128, (_TILE_F32_ELEMS // max(1, row_elems)) // 128 * 128)
        if rows >= 256:
            # keep >= 2 grid steps so both v7x TensorCores get a share of the stream
            tr = min(tr, _round_up(pl.cdiv(rows, 2), 128))
    if tr >= rows:
        return rows, 1            # single block covering the full (possibly ragged) axis
    return tr, pl.cdiv(rows, tr)


def _d2_and_known(x_ref, y_ref, c_ref, seg_ref):
    """Lane-dense (k, tr) squared distances + is_known mask for the current tile."""
    x = x_ref[...].astype(jnp.float32)          # (tr, k*D); bf16 stays bf16 in HBM, cast here
    diff = x - c_ref[...]                       # (1, k*D) tiled center broadcasts over rows
    diff2 = diff * diff
    # Segmented reduction over each D-wide group on the (otherwise idle) MXU:
    #   d2[s, r] = sum_d diff2[r, s*D + d]   ->  samples land on lanes.
    # bf16 hi/lo split keeps the result f32-exact even if the MXU rounds operands to bf16
    # (seg is exactly 0/1, hi is exactly representable in bf16).
    hi = diff2.astype(jnp.bfloat16).astype(jnp.float32)
    lo = diff2 - hi
    dims = (((1,), (1,)), ((), ()))
    seg = seg_ref[...]                          # (k, k*D) block-diagonal 0/1 selector
    d2 = (jax.lax.dot_general(seg, hi, dims, preferred_element_type=jnp.float32)
          + jax.lax.dot_general(seg, lo, dims, preferred_element_type=jnp.float32))
    known = y_ref[...] >= 0                     # (k, tr)  is_known(y)
    return d2, known


def _svdd_reduce_kernel(x_ref, y_ref, c_ref, seg_ref, psum_ref, *, valid_rows, tile):
    """'mean'/'sum' path: one lane-dense (1, 128) partial sum per tile (no per-sample HBM writes)."""
    d2, known = _d2_and_known(x_ref, y_ref, c_ref, seg_ref)
    loss = jnp.where(known, d2, 1.0 / d2)                    # exact 1/d2; tail is only (k, tr)
    col = pl.program_id(0) * tile + jax.lax.broadcasted_iota(jnp.int32, loss.shape, 1)
    loss = jnp.where(col < valid_rows, loss, 0.0)            # mask ragged last block (select, no NaN leak)
    psum_ref[...] = jnp.broadcast_to(jnp.sum(loss, keepdims=True), (1, 128))


def _svdd_persample_kernel(x_ref, y_ref, c_ref, seg_ref, loss_ref):
    """'none' path: full-lane (k, tr) store; the ragged tail is clipped on writeback."""
    d2, known = _d2_and_known(x_ref, y_ref, c_ref, seg_ref)
    loss_ref[...] = jnp.where(known, d2, 1.0 / d2)


def ss_deep_svdd_loss(x, y, center, reduction="mean", *, tile_rows=None):
    """x: (B, D) features (f32 or bf16), y: (B,) int labels (y < 0 == unknown/OOD),
    center: (1, D) or (D,) center mu.  Returns a scalar ('mean'/'sum') or (B,) ('none'/None).
    tile_rows (testing knob): folded rows of the (B/k, k*D) view per grid step."""
    B, D = x.shape

    # Fold k samples per row (free, contiguous reshape) so lanes are filled when D < 128.
    k = 1
    if D < 128:
        for cand in range(min(128 // D, B), 1, -1):
            if B % cand == 0:
                k = cand
                break
    kD = k * D
    R = B // k

    xf = x.reshape(R, kD)                                        # free view of x, no HBM copy
    y_t = jnp.asarray(y).reshape(R, k).astype(jnp.int32).T       # (k, R): y_t[s, r] = y[k*r + s] (tiny)
    c = jnp.asarray(center).reshape(1, D).astype(jnp.float32)
    c_tiled = jnp.tile(c, (1, k))                                # (1, k*D)
    seg = jnp.repeat(jnp.eye(k, dtype=jnp.float32), D, axis=1)   # (k, k*D) block-diagonal selector

    tr, g = _choose_tile(R, kD, tile_rows)

    in_specs = [
        pl.BlockSpec((tr, kD), lambda i: (i, 0)),    # x tile, native dtype (bf16 halves DMA bytes)
        pl.BlockSpec((k, tr), lambda i: (0, i)),     # labels, samples on lanes
        pl.BlockSpec((1, kD), lambda i: (0, 0)),     # tiled center (resident across tiles)
        pl.BlockSpec((k, kD), lambda i: (0, 0)),     # segment selector (resident across tiles)
    ]
    cparams = pltpu.CompilerParams(
        dimension_semantics=("parallel",),           # no cross-tile carry -> megacore sharding on v7x
        vmem_limit_bytes=32 * 1024 * 1024,
    )

    if reduction in ("mean", "sum"):
        # Per-sample loss never hits HBM; each tile writes one lane-dense (1, 128) partial-sum block.
        psums = pl.pallas_call(
            functools.partial(_svdd_reduce_kernel, valid_rows=R, tile=tr),
            out_shape=jax.ShapeDtypeStruct((1, 128 * g), jnp.float32),
            grid=(g,),
            in_specs=in_specs,
            out_specs=pl.BlockSpec((1, 128), lambda i: (0, i)),
            compiler_params=cparams,
        )(xf, y_t, c_tiled, seg)
        total = jnp.sum(psums.reshape(g, 128)[:, 0])             # lane 0 of each tile's block
        return total / B if reduction == "mean" else total       # divide by the true B

    # 'none' / None: lane-dense (k, R) per-sample losses, un-folded back to sample order (4 B/sample).
    loss = pl.pallas_call(
        _svdd_persample_kernel,
        out_shape=jax.ShapeDtypeStruct((k, R), jnp.float32),
        grid=(g,),
        in_specs=in_specs,
        out_specs=pl.BlockSpec((k, tr), lambda i: (0, i)),
        compiler_params=cparams,
    )(xf, y_t, c_tiled, seg)
    return loss.T.reshape(B)


def _ref_loss(x, y, center):
    xf = x.astype(jnp.float32)
    c = jnp.asarray(center).reshape(1, -1).astype(jnp.float32)
    d2 = jnp.sum((xf - c) ** 2, axis=-1)
    return jnp.where(jnp.asarray(y) >= 0, d2, 1.0 / d2)


if __name__ == "__main__":
    key = jax.random.PRNGKey(0)
    kx, kc, k2, k3, k4 = jax.random.split(key, 5)

    D = 32
    # ClassCenters(1, n_features) parameter shape is (1, D); small nonzero center keeps 1/d2 finite.
    center = 0.1 * jax.random.normal(kc, (1, D), dtype=jnp.float32)

    # --- small case: B=8 (module toy shape); folds k=4 samples/row, single tile ---
    B = 8
    x = jax.random.normal(kx, (B, D), dtype=jnp.float32)
    y = jnp.array([0, 1, -1, 2, -1, 0, 3, -1], dtype=jnp.int32)     # y < 0 == unknown/OOD
    ref = _ref_loss(x, y, center)

    out_mean = jax.block_until_ready(ss_deep_svdd_loss(x, y, center, reduction="mean"))
    assert jnp.allclose(out_mean, jnp.mean(ref), rtol=2e-3, atol=1e-4), (out_mean, jnp.mean(ref))
    out_none = jax.block_until_ready(ss_deep_svdd_loss(x, y, center, reduction="none"))
    assert out_none.shape == (B,)
    assert jnp.allclose(out_none, ref, rtol=2e-3, atol=1e-4), (out_none, ref)

    # --- multi-tile case with a ragged last block (no padding): R=325 folded rows, tr=128 -> grid=3 ---
    B2 = 1300
    x2 = jax.random.normal(k2, (B2, D), dtype=jnp.float32)
    y2 = jnp.where(jax.random.uniform(k3, (B2,)) < 0.3, -1, 1).astype(jnp.int32)
    ref2 = _ref_loss(x2, y2, center)

    out2_mean = jax.block_until_ready(
        ss_deep_svdd_loss(x2, y2, center, reduction="mean", tile_rows=128))
    assert jnp.allclose(out2_mean, jnp.mean(ref2), rtol=2e-3, atol=1e-4), (out2_mean, jnp.mean(ref2))
    out2_sum = jax.block_until_ready(
        ss_deep_svdd_loss(x2, y2, center, reduction="sum", tile_rows=128))
    assert jnp.allclose(out2_sum, jnp.sum(ref2), rtol=2e-3, atol=1e-2), (out2_sum, jnp.sum(ref2))
    out2_none = jax.block_until_ready(
        ss_deep_svdd_loss(x2, y2, center, reduction="none", tile_rows=128))
    assert jnp.allclose(out2_none, ref2, rtol=2e-3, atol=1e-4)

    # --- prime batch: no fold possible (k=1 path), d2 produced directly as a lane row ---
    B3 = 7
    x3 = jax.random.normal(k4, (B3, D), dtype=jnp.float32)
    y3 = jnp.array([0, -1, 1, -1, 2, 3, -1], dtype=jnp.int32)
    ref3 = _ref_loss(x3, y3, center)
    out3_none = jax.block_until_ready(ss_deep_svdd_loss(x3, y3, center, reduction="none"))
    assert jnp.allclose(out3_none, ref3, rtol=2e-3, atol=1e-4), (out3_none, ref3)
    out3_mean = jax.block_until_ready(ss_deep_svdd_loss(x3, y3, center, reduction="mean"))
    assert jnp.allclose(out3_mean, jnp.mean(ref3), rtol=2e-3, atol=1e-4)

    # --- bf16 features: half the HBM bytes, cast to f32 inside the kernel ---
    xb = x.astype(jnp.bfloat16)
    refb = _ref_loss(xb, y, center)
    outb = jax.block_until_ready(ss_deep_svdd_loss(xb, y, center, reduction="mean"))
    assert jnp.allclose(outb, jnp.mean(refb), rtol=2e-3, atol=1e-4), (outb, jnp.mean(refb))

    print("KERNEL_OK")
</pallas_src>

<mosaic_0001>
module attributes {stable_mosaic.version = 11 : i64} {
  func.func @_svdd_reduce_kernel(%arg0: i32, %arg1: memref<2x128xf32, #tpu.memory_space<vmem>>, %arg2: memref<4x2xi32, #tpu.memory_space<vmem>>, %arg3: memref<1x128xf32, #tpu.memory_space<vmem>>, %arg4: memref<4x128xf32, #tpu.memory_space<vmem>>, %arg5: memref<1x128xf32, #tpu.memory_space<vmem>>) attributes {dimension_semantics = [#tpu.dimension_semantics<parallel>], iteration_bounds = array<i64: 1>, scalar_prefetch = 0 : i64, scratch_operands = 0 : i64, tpu.core_type = #tpu.core_type<tc>, window_params = [{transform_indices = @transform_0, window_bounds = array<i64: 2, 128>}, {transform_indices = @transform_1, window_bounds = array<i64: 4, 2>}, {pipeline_mode = #tpu.pipeline_mode<synchronous>, transform_indices = @transform_2, window_bounds = array<i64: 1, 128>}, {pipeline_mode = #tpu.pipeline_mode<synchronous>, transform_indices = @transform_3, window_bounds = array<i64: 4, 128>}, {transform_indices = @transform_4, window_bounds = array<i64: 1, 128>}]} {
    %c0 = arith.constant 0 : index
    %c0_0 = arith.constant 0 : index
    %0 = vector.load %arg1[%c0, %c0_0] : memref<2x128xf32, #tpu.memory_space<vmem>>, vector<2x128xf32>
    %c0_1 = arith.constant 0 : index
    %c0_2 = arith.constant 0 : index
    %1 = vector.load %arg3[%c0_1, %c0_2] : memref<1x128xf32, #tpu.memory_space<vmem>>, vector<1x128xf32>
    %2 = vector.broadcast %1 : vector<1x128xf32> to vector<2x128xf32>
    %3 = arith.subf %0, %2 : vector<2x128xf32>
    %4 = arith.mulf %3, %3 : vector<2x128xf32>
    %5 = arith.truncf %4 : vector<2x128xf32> to vector<2x128xbf16>
    %6 = arith.extf %5 : vector<2x128xbf16> to vector<2x128xf32>
    %7 = arith.subf %4, %6 : vector<2x128xf32>
    %c0_3 = arith.constant 0 : index
    %c0_4 = arith.constant 0 : index
    %8 = vector.load %arg4[%c0_3, %c0_4] : memref<4x128xf32, #tpu.memory_space<vmem>>, vector<4x128xf32>
    %cst = arith.constant dense<0.000000e+00> : vector<4x2xf32>
    %9 = tpu.matmul %8, %6, %cst {dimension_numbers = #tpu.dot_dimension_numbers<[1], [1], [0], [0], [0, 0, 1, 0], [], []>} : vector<4x128xf32>, vector<2x128xf32>, vector<4x2xf32> -> vector<4x2xf32>
    %cst_5 = arith.constant dense<0.000000e+00> : vector<4x2xf32>
    %10 = tpu.matmul %8, %7, %cst_5 {dimension_numbers = #tpu.dot_dimension_numbers<[1], [1], [0], [0], [0, 0, 1, 0], [], []>} : vector<4x128xf32>, vector<2x128xf32>, vector<4x2xf32> -> vector<4x2xf32>
    %11 = arith.addf %9, %10 : vector<4x2xf32>
    %c0_6 = arith.constant 0 : index
    %c0_7 = arith.constant 0 : index
    %12 = vector.load %arg2[%c0_6, %c0_7] : memref<4x2xi32, #tpu.memory_space<vmem>>, vector<4x2xi32>
    %c0_i32 = arith.constant 0 : i32
    %13 = vector.broadcast %c0_i32 : i32 to vector<4x2xi32>
    %14 = arith.cmpi sge, %12, %13 : vector<4x2xi32>
    %cst_8 = arith.constant 1.000000e+00 : f32
    %15 = vector.broadcast %cst_8 : f32 to vector<4x2xf32>
    %16 = arith.divf %15, %11 : vector<4x2xf32>
    %17 = arith.select %14, %11, %16 : vector<4x2xi1>, vector<4x2xf32>
    %c2_i32 = arith.constant 2 : i32
    %18 = arith.muli %arg0, %c2_i32 : i32
    %19 = tpu.iota {dimensions = array<i32: 1>} : vector<4x2xi32>
    %20 = vector.broadcast %18 : i32 to vector<4x2xi32>
    %21 = arith.addi %20, %19 : vector<4x2xi32>
    %c2_i32_9 = arith.constant 2 : i32
    %22 = vector.broadcast %c2_i32_9 : i32 to vector<4x2xi32>
    %23 = arith.cmpi slt, %21, %22 : vector<4x2xi32>
    %cst_10 = arith.constant 0.000000e+00 : f32
    %24 = vector.broadcast %cst_10 : f32 to vector<4x2xf32>
    %25 = arith.select %23, %17, %24 : vector<4x2xi1>, vector<4x2xf32>
    %26 = vector.shape_cast %25 : vector<4x2xf32> to vector<1x4x2xf32>
    %cst_11 = arith.constant dense<0.000000e+00> : vector<1xf32>
    %27 = vector.multi_reduction <add>, %26, %cst_11 [1, 2] : vector<1x4x2xf32> to vector<1xf32>
    %28 = vector.shape_cast %27 : vector<1xf32> to vector<1x1x1xf32>
    %29 = vector.extract %28[0, 0, 0] : f32 from vector<1x1x1xf32>
    %30 = vector.broadcast %29 : f32 to vector<1x1xf32>
    %31 = vector.shape_cast %30 : vector<1x1xf32> to vector<1x1xf32>
    %32 = vector.broadcast %31 : vector<1x1xf32> to vector<1x128xf32>
    %c0_12 = arith.constant 0 : index
    %c0_13 = arith.constant 0 : index
    %33 = vector.load %arg5[%c0_12, %c0_13] : memref<1x128xf32, #tpu.memory_space<vmem>>, vector<1x128xf32>
    tpu.vector_store %arg5[%c0_12, %c0_13], %32 {strides = array<i32>} : memref<1x128xf32, #tpu.memory_space<vmem>>, vector<1x128xf32>,
    return
  }
  func.func @transform_0(%arg0: i32) -> (i32, i32) {
    %c0_i32 = arith.constant 0 : i32
    %c0_i32_0 = arith.constant 0 : i32
    return %arg0, %c0_i32 : i32, i32
  }
  func.func @transform_1(%arg0: i32) -> (i32, i32) {
    %c0_i32 = arith.constant 0 : i32
    %c0_i32_0 = arith.constant 0 : i32
    return %c0_i32, %arg0 : i32, i32
  }
  func.func @transform_2(%arg0: i32) -> (i32, i32) {
    %c0_i32 = arith.constant 0 : i32
    %c0_i32_0 = arith.constant 0 : i32
    %c0_i32_1 = arith.constant 0 : i32
    return %c0_i32, %c0_i32_0 : i32, i32
  }
  func.func @transform_3(%arg0: i32) -> (i32, i32) {
    %c0_i32 = arith.constant 0 : i32
    %c0_i32_0 = arith.constant 0 : i32
    %c0_i32_1 = arith.constant 0 : i32
    return %c0_i32, %c0_i32_0 : i32, i32
  }
  func.func @transform_4(%arg0: i32) -> (i32, i32) {
    %c0_i32 = arith.constant 0 : i32
    %c0_i32_0 = arith.constant 0 : i32
    return %c0_i32, %arg0 : i32, i32
  }
}

</mosaic_0001>

<bundles_post_ra>
// kernel: tpu_custom_call.1
= control target key start
LH: loop header
LB: loop body
LE: loop exit
PB: predicated region body
PF: predicated region fallthrough
CT: control target
= control target key end

     0   :  { %s196_s0 = inlined_call_operand.vmem [shape: f32[2,128], index: 0, kind: input, shape index: {}]   ;;  %s197_s1 = inlined_call_operand.vmem [shape: s32[4,2], index: 1, kind: input, shape index: {}]   ;;  %s198_s2 = inlined_call_operand.vmem [shape: f32[1,128], index: 2, kind: input, shape index: {}]   ;;  %s199_s3 = inlined_call_operand.vmem [shape: f32[4,128], index: 3, kind: input, shape index: {}]   ;;  %s200_s4 = inlined_call_operand.hbm [shape: f32[1,128], index: 4, kind: output, shape index: {}]  }
   0x1   :  { %v18_v0 = vld [vmem:[%s196_s0] sm:$0x3] }
   0x2   :  { %v126_v1 = vld [vmem:[%s198_s2] ss:$0 sm:$0xff] }
   0x3   :  { %9 = vsyncpa [#allocation3], 0  ;;  %v23_v2 = vsub.f32 %v18_v0, %v126_v1  ;;  %v28_v7 = vld [vmem:[%s199_s3] sm:$0xf]  ;;  %v88_v13 = vlaneseq  ;;  %vm94_vm6 = vcmask 11264   ;;  %s114_s23 = sshll.u32 %s200_s4, 4  ;;  %s115_s23 = int_to_ptr.hbm [resolvable:$true] %s114_s23 }
   0x4   :  { %v69_v16 = vld [vmem:[%s197_s1] sm:$0xf]  ;;  %s155_s1 = smov [#allocation2]  }
   0x5   :  { %v24_v3 = vmul.f32 %v23_v2, %v23_v2  ;;  %v89_v19 = vand.u32 127, %v88_v13  ;;  %vm70_vm2 = vcmp.ge.s32.totalorder %v69_v16, 0  ;;  %s112_s3 = sshll.u32 %s155_s1, 4  ;;  %s113_s3 = int_to_ptr.vmem [resolvable:$true] %s112_s3 }
   0x7   :  { %v25_v4 = vpack.c.bf16 %v24_v3, %v24_v3  ;;  %vm92_vm5 = vcmp.lt.s32.totalorder %v89_v19, 2 }
   0x9   :  { %v26_v5 = vunpack.c.l.bf16 %v25_v4 }
   0xb   :  { %v27_v6 = vsub.f32 %v24_v3, %v26_v5  ;;  %64 = vmatpush.xpose.msra.mxu1 %v26_v5 }
   0xd   :  { %44 = vmatpush.xpose.msra.mxu0 %v27_v6 }
   0xe   :  { %65 = vmatmul.f32.vlgmr.msra.gmra.mxu1 %v28_v7 }
  0x10   :  { %45 = vmatmul.f32.vlgmr.msra.gmra.mxu0 %v28_v7 }
  0x8b   :  { %v66_v8 = vpop.f32.mrf.mxu1 }
  0x8d   :  { %v46_v9 = vpop.f32.mrf.mxu0 }
  0x8e   :  { %v67_v10 = vadd.f32 %v66_v8, %v46_v9 }
  0x90   :  { %127 = vrcp.f32 %v67_v10  ;;  %v82_v15 = vand.u32 2147483648, %v67_v10  ;;  %v80_v18 = vand.u32 2147483647, %v67_v10  ;;  %vm76_vm1 = vweird.f32 %v67_v10 }
  0x92   :  { %v83_v21 = vor.u32 1.1754944e-38, %v82_v15  ;;  %vm81_vm4 = vcmp.eq.f32.partialorder %v80_v18, 8.507059e+37 }
  0x96   :  { %v128_v11 = vpop.eup %127 }
  0x97   :  { %v72_v12 = vmul.f32 %v128_v11, %v67_v10  ;;  %vm77_vm0 = vweird.f32 %v128_v11 }
  0x98   :  { %vm78_vm3 = vmor %vm76_vm1, %vm77_vm0 }
  0x99   :  { %v73_v14 = vsub.f32 1.0, %v72_v12 }
  0x9b   :  { %v74_v17 = vmul.f32 %v128_v11, %v73_v14 }
  0x9d   :  { %v75_v20 = vadd.f32 %v128_v11, %v74_v17 }
  0x9f   :  { %v79_v22 = vsel %vm78_vm3, %v128_v11, %v75_v20 }
  0xa0   :  { %v84_v23 = vsel %vm81_vm4, %v83_v21, %v79_v22 }
  0xa1   :  { %v86_v24 = vsel %vm70_vm2, %v67_v10, %v84_v23 }
  0xa2   :  { %v93_v25 = vsel %vm92_vm5, %v86_v24, 0.0 }
  0xa3   :  { %v95_v26 = vsel %vm94_vm6, %v93_v25, 0.0 }
  0xa4   :  { %96 = vadd.xlane.f32.xlu0 %v95_v26 }
 0x117   :  { %v97_v27 = vpop.xlane.xlu0 %96 }
 0x118   :  { %v98_v28 = vrot.slane %v97_v27, 4 }
 0x11a   :  { %v99_v29 = vadd.f32 %v98_v28, %v97_v27 }
 0x11c   :  { %v100_v30 = vrot.slane %v99_v29, 2 }
 0x11e   :  { %v101_v31 = vadd.f32 %v100_v30, %v99_v29 }
 0x120   :  { %v102_v32 = vrot.slane %v101_v31, 1 }
 0x122   :  { %v103_v33 = vadd.f32 %v102_v32, %v101_v31 }
 0x124   :  { %123 = vpush %v103_v33 }
 0x155   :  { %s124_s24 = spop %123 }
 0x156   :  { %v105_v34 = vstv %s124_s24 }
 0x157   :  { %106 = vst [vmem:[#allocation2] sm:$0x1] %v105_v34 }
 0x158   :  { %117 = dma.vmem_to_hbm [thread:$0]  %s113_s3, 16, %s115_s23, [#allocation3]  }
 0x159   :  { %153 = dma.done.wait [#allocation3], 16  }
 0x15a   :  { %154 = vsyncadd [#allocation3], 4294967280 }
 0x15b   :  { %122 = vsyncpa [#allocation3], 1 }

</bundles_post_ra>
